<compile_context>
chip_gen: v7x
topology: tpu7x:2x2x1
jax: 0.10.0
libtpu: 0.0.40
codegen_flags: <defaults>
</compile_context>

<pallas_src>
import functools

import jax
import jax.numpy as jnp
from jax.experimental import pallas as pl
from jax.experimental.pallas import tpu as pltpu


def _vmem_budget():
    """(per-step working-set budget, scoped VMEM limit) derived from the actual chip."""
    try:
        cap = int(pltpu.get_tpu_info().vmem_capacity_bytes)
    except Exception:
        cap = 64 * 1024 * 1024  # conservative fallback (v7x per-core VMEM)
    return cap // 2, min(int(cap * 0.9), 120 * 1024 * 1024)


def _device_kind():
    try:
        return jax.devices()[0].device_kind.lower()
    except Exception:
        return ""


def _is_megacore():
    kind = _device_kind()
    return any(tag in kind for tag in ("v4", "v5p", "v7"))


def _has_bf16_valu():
    kind = _device_kind()
    return ("v6" in kind) or ("v7" in kind)


def _choose_row_tile(n, c_in, m, ksize, L, sw, l_out_k, x_bytes, s_bytes, budget, min_steps):
    """Pick rt_in = folded INPUT rows per grid step (output block = (rt_in, m*l_out_k)).

    Candidates keep rt_in a dtype-packed sublane multiple (or the full folded extent) and
    always divide n*c_in evenly.  block_bytes() is monotone in rt_in, so candidates are
    scanned largest-first.
    """
    r_in = n * c_in
    o_cols = m * l_out_k

    def block_bytes(rt):
        return (2 * rt * L * x_bytes              # input tile, double-buffered
                + 2 * rt * o_cols * x_bytes       # output tile, double-buffered
                + 2 * rt * m * (ksize + 1) * 4    # weight + bias tiles
                + rt * sw * s_bytes)              # padded-input scratch (single instance)

    sub = 8 * max(1, 4 // x_bytes)                # sublane packing: 8 f32 / 16 bf16 / 32 int8
    cands = [r_in]                                # whole problem in one grid step
    cands += [bt * c_in for bt in range(n - 1, 0, -1)
              if n % bt == 0 and (bt * c_in) % sub == 0]
    cands += sorted((ct for ct in range(sub, c_in, sub) if c_in % ct == 0), reverse=True)

    fitting = [rt for rt in cands if block_bytes(rt) <= budget]
    if not fitting:
        # TODO(synk): add an L-tiling grid axis with a K-1 halo so one row tile never has
        # to hold the full length; until then fall back to the smallest row tile.
        return cands[-1]

    # Big problems: want enough grid steps for DMA/compute overlap and, on megacore chips,
    # at least 2 steps per TensorCore.  Tiny problems run in a single step.
    big = r_in * o_cols * x_bytes > (2 << 20)
    if big:
        for rt in fitting:
            if r_in // rt >= min_steps:
                return rt
    return fitting[0]


def _make_kernel(m, rt_in, ksize, L, pad_l, sw, l_out_k, scratch_dtype):
    def kernel(x_ref, w_ref, b_ref, o_ref, xpad_ref):
        # x_ref:    (rt_in, L)           unpadded input rows (batch*in-channel folded)
        # w_ref:    (rt_in, m*K)         taps, laid out (mm, k) along lanes
        # b_ref:    (rt_in, m)           bias per (row, mm)
        # o_ref:    (rt_in, m*l_out_k)   m output channels side by side along lanes
        # xpad_ref: (rt_in, sw)          zero-padded input halo scratch (VMEM)

        # Fused F.pad: tiny halo zero-fills + payload.  Kept per-step (see header note on
        # megacore "parallel" splits and per-core scratch).
        if pad_l:
            xpad_ref[:, :pad_l] = jnp.zeros((rt_in, pad_l), scratch_dtype)
        rz = sw - pad_l - L
        if rz:
            xpad_ref[:, pad_l + L:] = jnp.zeros((rt_in, rz), scratch_dtype)
        xpad_ref[:, pad_l:pad_l + L] = x_ref[...].astype(scratch_dtype)

        w = w_ref[...].astype(jnp.float32)         # (rt_in, m*K)
        b = b_ref[...].astype(jnp.float32)         # (rt_in, m)

        # K shifted MACs on the VPU.  Each tap is ONE lane-offset VMEM load from the
        # padded scratch, reused for all m output channels (no replicated data anywhere).
        acc = [jnp.zeros((rt_in, l_out_k), jnp.float32) for _ in range(m)]
        for k in range(ksize):                     # K is small & static -> fully unrolled
            tap = xpad_ref[:, k:k + l_out_k].astype(jnp.float32)
            for mm in range(m):
                acc[mm] = acc[mm] + w[:, mm * ksize + k:mm * ksize + k + 1] * tap

        for mm in range(m):
            o_ref[:, mm * l_out_k:(mm + 1) * l_out_k] = (
                acc[mm] + b[:, mm:mm + 1]).astype(o_ref.dtype)

    return kernel


@functools.partial(jax.jit, static_argnames=("padding",))
def depthwise_conv1d(x, weight, bias, padding):
    """x: (N, C_in, L); weight: (C_out, 1, K); bias: (C_out,); padding: (left, right)."""
    n, c_in, L = x.shape
    c_out, _, ksize = weight.shape
    assert c_out % c_in == 0, "grouped conv requires ch_out % ch_in == 0"
    m = c_out // c_in
    pad_l, pad_r = padding
    assert pad_l >= 0 and pad_r >= 0, "negative (cropping) F.pad not supported"

    l_out = L + pad_l + pad_r - ksize + 1
    assert l_out > 0

    # Lane-dense stores only when cheap: pad l_out up to a multiple of 128 iff the extra
    # HBM write traffic is <= 25%; otherwise emit the exact width (full-dim block) and
    # accept a masked tail store (the kernel is HBM-bound at small K).
    LANE = 128
    l_up = ((l_out + LANE - 1) // LANE) * LANE
    l_out_k = l_up if (l_up != l_out and 4 * l_up <= 5 * l_out) else l_out
    sw = l_out_k + ksize - 1                       # scratch width: payload + halos

    # bf16 scratch on chips with a bf16 VALU (halves scratch + tap-load bytes); f32 on v5e.
    scratch_dtype = (jnp.bfloat16
                     if (x.dtype == jnp.bfloat16 and _has_bf16_valu())
                     else jnp.float32)
    s_bytes = 2 if scratch_dtype == jnp.bfloat16 else 4

    budget, vmem_limit = _vmem_budget()
    min_steps = 4 if _is_megacore() else 2
    rt_in = _choose_row_tile(n, c_in, m, ksize, L, sw, l_out_k,
                             x.dtype.itemsize, s_bytes, budget, min_steps)
    r_in = n * c_in
    grid = (r_in // rt_in,)

    xf = x.reshape(r_in, L)                        # free reshape: fold batch onto sublanes
    w2 = weight.reshape(c_in, m * ksize)           # row ci, lanes ordered (mm, k) -- free view
    b2 = bias.reshape(c_in, m)

    if rt_in >= c_in:
        # Block covers whole batch elements: same tiny weight block every step (fetched once).
        reps = rt_in // c_in
        w_arr = jnp.tile(w2, (reps, 1)) if reps > 1 else w2
        b_arr = jnp.tile(b2, (reps, 1)) if reps > 1 else b2
        w_map = lambda j: (0, 0)
        b_map = lambda j: (0, 0)
    else:
        # Within-batch channel tiles: cycle through the weight row tiles.
        tpb = c_in // rt_in
        w_arr, b_arr = w2, b2
        w_map = lambda j: (j % tpb, 0)
        b_map = lambda j: (j % tpb, 0)

    kernel = _make_kernel(m, rt_in, ksize, L, pad_l, sw, l_out_k, scratch_dtype)

    out_bytes = r_in * m * l_out_k * x.dtype.itemsize
    cost = pl.CostEstimate(
        flops=2 * ksize * n * c_out * l_out,
        bytes_accessed=(x.size * x.dtype.itemsize + out_bytes
                        + weight.size * weight.dtype.itemsize
                        + bias.size * bias.dtype.itemsize),
        transcendentals=0,
    )

    out = pl.pallas_call(
        kernel,
        out_shape=jax.ShapeDtypeStruct((r_in, m * l_out_k), x.dtype),
        grid=grid,
        in_specs=[
            pl.BlockSpec((rt_in, L), lambda j: (j, 0)),
            pl.BlockSpec((rt_in, m * ksize), w_map),
            pl.BlockSpec((rt_in, m), b_map),
        ],
        out_specs=pl.BlockSpec((rt_in, m * l_out_k), lambda j: (j, 0)),
        scratch_shapes=[pltpu.VMEM((rt_in, sw), scratch_dtype)],
        compiler_params=pltpu.CompilerParams(
            dimension_semantics=("parallel",),
            vmem_limit_bytes=vmem_limit,
        ),
        cost_estimate=cost,
    )(xf, w_arr, b_arr)

    out = out.reshape(n, c_in, m, l_out_k)         # free view of (N, C_out, l_out_k)
    if l_out_k != l_out:
        out = out[..., :l_out]                     # drop lane-pad columns (hold bias only)
    return out.reshape(n, c_out, l_out)


if __name__ == "__main__":
    # Module config (synthetic, deterministic): ch_in=4, ch_out=8 (depth mult 2),
    # kernel_size=3, causal padding (2, 0) -> L_out == L.
    N, C_IN, C_OUT, K, L = 2, 4, 8, 3, 16
    PADDING = (2, 0)

    key = jax.random.PRNGKey(0)
    kx, kw, kb = jax.random.split(key, 3)

    x = jax.random.normal(kx, (N, C_IN, L), dtype=jnp.float32)

    # nn.Conv1d(ch_in, ch_out, K, groups=ch_in): weight (C_out, 1, K), bias (C_out,)
    # initialized uniform(-bound, bound), bound = 1/sqrt(fan_in) = 1/sqrt(1*K).
    bound = 1.0 / (K ** 0.5)
    weight = jax.random.uniform(kw, (C_OUT, 1, K), jnp.float32, -bound, bound)
    bias = jax.random.uniform(kb, (C_OUT,), jnp.float32, -bound, bound)

    out = depthwise_conv1d(x, weight, bias, PADDING)
    out = jax.block_until_ready(out)

    # Pure-JAX reference (grouped conv, same semantics as PyTorch Conv1d).
    x_pad = jnp.pad(x, ((0, 0), (0, 0), (PADDING[0], PADDING[1])))
    ref = jax.lax.conv_general_dilated(
        x_pad, weight, window_strides=(1,), padding="VALID",
        dimension_numbers=("NCH", "OIH", "NCH"), feature_group_count=C_IN,
    ) + bias[None, :, None]

    assert out.shape == ref.shape == (N, C_OUT, L)
    assert jnp.allclose(out, ref, atol=1e-5, rtol=1e-5)
    print("KERNEL_OK")
</pallas_src>

<mosaic_0001>
module attributes {stable_mosaic.version = 11 : i64} {
  func.func @kernel(%arg0: i32, %arg1: memref<8x16xf32, #tpu.memory_space<vmem>>, %arg2: memref<8x6xf32, #tpu.memory_space<vmem>>, %arg3: memref<8x2xf32, #tpu.memory_space<vmem>>, %arg4: memref<8x32xf32, #tpu.memory_space<vmem>>, %arg5: memref<8x18xf32, #tpu.memory_space<vmem>>) attributes {dimension_semantics = [#tpu.dimension_semantics<parallel>], iteration_bounds = array<i64: 1>, scalar_prefetch = 0 : i64, scratch_operands = 1 : i64, tpu.core_type = #tpu.core_type<tc>, window_params = [{transform_indices = @transform_0, window_bounds = array<i64: 8, 16>}, {pipeline_mode = #tpu.pipeline_mode<synchronous>, transform_indices = @transform_1, window_bounds = array<i64: 8, 6>}, {pipeline_mode = #tpu.pipeline_mode<synchronous>, transform_indices = @transform_2, window_bounds = array<i64: 8, 2>}, {transform_indices = @transform_3, window_bounds = array<i64: 8, 32>}]} {
    %cst = arith.constant 0.000000e+00 : f32
    %0 = vector.broadcast %cst : f32 to vector<8x2xf32>
    %c0 = arith.constant 0 : index
    %c0_0 = arith.constant 0 : index
    %1 = vector.load %arg5[%c0, %c0_0] : memref<8x18xf32, #tpu.memory_space<vmem>>, vector<8x2xf32>
    tpu.vector_store %arg5[%c0, %c0_0], %0 {strides = array<i32>} : memref<8x18xf32, #tpu.memory_space<vmem>>, vector<8x2xf32>,
    %c0_1 = arith.constant 0 : index
    %c0_2 = arith.constant 0 : index
    %2 = vector.load %arg1[%c0_1, %c0_2] : memref<8x16xf32, #tpu.memory_space<vmem>>, vector<8x16xf32>
    %c0_3 = arith.constant 0 : index
    %c2 = arith.constant 2 : index
    %3 = vector.load %arg5[%c0_3, %c2] : memref<8x18xf32, #tpu.memory_space<vmem>>, vector<8x16xf32>
    tpu.vector_store %arg5[%c0_3, %c2], %2 {strides = array<i32>} : memref<8x18xf32, #tpu.memory_space<vmem>>, vector<8x16xf32>,
    %c0_4 = arith.constant 0 : index
    %c0_5 = arith.constant 0 : index
    %4 = vector.load %arg2[%c0_4, %c0_5] : memref<8x6xf32, #tpu.memory_space<vmem>>, vector<8x6xf32>
    %c0_6 = arith.constant 0 : index
    %c0_7 = arith.constant 0 : index
    %5 = vector.load %arg3[%c0_6, %c0_7] : memref<8x2xf32, #tpu.memory_space<vmem>>, vector<8x2xf32>
    %cst_8 = arith.constant 0.000000e+00 : f32
    %6 = vector.broadcast %cst_8 : f32 to vector<8x16xf32>
    %cst_9 = arith.constant 0.000000e+00 : f32
    %7 = vector.broadcast %cst_9 : f32 to vector<8x16xf32>
    %c0_10 = arith.constant 0 : index
    %c0_11 = arith.constant 0 : index
    %8 = vector.load %arg5[%c0_10, %c0_11] : memref<8x18xf32, #tpu.memory_space<vmem>>, vector<8x16xf32>
    %9 = vector.extract_strided_slice %4 {offsets = [0, 0], sizes = [8, 1], strides = [1, 1]} : vector<8x6xf32> to vector<8x1xf32>
    %10 = vector.broadcast %9 : vector<8x1xf32> to vector<8x16xf32>
    %11 = arith.mulf %10, %8 : vector<8x16xf32>
    %12 = arith.addf %6, %11 : vector<8x16xf32>
    %13 = vector.extract_strided_slice %4 {offsets = [0, 3], sizes = [8, 1], strides = [1, 1]} : vector<8x6xf32> to vector<8x1xf32>
    %14 = vector.broadcast %13 : vector<8x1xf32> to vector<8x16xf32>
    %15 = arith.mulf %14, %8 : vector<8x16xf32>
    %16 = arith.addf %7, %15 : vector<8x16xf32>
    %c0_12 = arith.constant 0 : index
    %c1 = arith.constant 1 : index
    %17 = vector.load %arg5[%c0_12, %c1] : memref<8x18xf32, #tpu.memory_space<vmem>>, vector<8x16xf32>
    %18 = vector.extract_strided_slice %4 {offsets = [0, 1], sizes = [8, 1], strides = [1, 1]} : vector<8x6xf32> to vector<8x1xf32>
    %19 = vector.broadcast %18 : vector<8x1xf32> to vector<8x16xf32>
    %20 = arith.mulf %19, %17 : vector<8x16xf32>
    %21 = arith.addf %12, %20 : vector<8x16xf32>
    %22 = vector.extract_strided_slice %4 {offsets = [0, 4], sizes = [8, 1], strides = [1, 1]} : vector<8x6xf32> to vector<8x1xf32>
    %23 = vector.broadcast %22 : vector<8x1xf32> to vector<8x16xf32>
    %24 = arith.mulf %23, %17 : vector<8x16xf32>
    %25 = arith.addf %16, %24 : vector<8x16xf32>
    %c0_13 = arith.constant 0 : index
    %c2_14 = arith.constant 2 : index
    %26 = vector.load %arg5[%c0_13, %c2_14] : memref<8x18xf32, #tpu.memory_space<vmem>>, vector<8x16xf32>
    %27 = vector.extract_strided_slice %4 {offsets = [0, 2], sizes = [8, 1], strides = [1, 1]} : vector<8x6xf32> to vector<8x1xf32>
    %28 = vector.broadcast %27 : vector<8x1xf32> to vector<8x16xf32>
    %29 = arith.mulf %28, %26 : vector<8x16xf32>
    %30 = arith.addf %21, %29 : vector<8x16xf32>
    %31 = vector.extract_strided_slice %4 {offsets = [0, 5], sizes = [8, 1], strides = [1, 1]} : vector<8x6xf32> to vector<8x1xf32>
    %32 = vector.broadcast %31 : vector<8x1xf32> to vector<8x16xf32>
    %33 = arith.mulf %32, %26 : vector<8x16xf32>
    %34 = arith.addf %25, %33 : vector<8x16xf32>
    %35 = vector.extract_strided_slice %5 {offsets = [0, 0], sizes = [8, 1], strides = [1, 1]} : vector<8x2xf32> to vector<8x1xf32>
    %36 = vector.broadcast %35 : vector<8x1xf32> to vector<8x16xf32>
    %37 = arith.addf %30, %36 : vector<8x16xf32>
    %c0_15 = arith.constant 0 : index
    %c0_16 = arith.constant 0 : index
    %38 = vector.load %arg4[%c0_15, %c0_16] : memref<8x32xf32, #tpu.memory_space<vmem>>, vector<8x16xf32>
    tpu.vector_store %arg4[%c0_15, %c0_16], %37 {strides = array<i32>} : memref<8x32xf32, #tpu.memory_space<vmem>>, vector<8x16xf32>,
    %39 = vector.extract_strided_slice %5 {offsets = [0, 1], sizes = [8, 1], strides = [1, 1]} : vector<8x2xf32> to vector<8x1xf32>
    %40 = vector.broadcast %39 : vector<8x1xf32> to vector<8x16xf32>
    %41 = arith.addf %34, %40 : vector<8x16xf32>
    %c0_17 = arith.constant 0 : index
    %c16 = arith.constant 16 : index
    %42 = vector.load %arg4[%c0_17, %c16] : memref<8x32xf32, #tpu.memory_space<vmem>>, vector<8x16xf32>
    tpu.vector_store %arg4[%c0_17, %c16], %41 {strides = array<i32>} : memref<8x32xf32, #tpu.memory_space<vmem>>, vector<8x16xf32>,
    return
  }
  func.func @transform_0(%arg0: i32) -> (i32, i32) {
    %c0_i32 = arith.constant 0 : i32
    %c0_i32_0 = arith.constant 0 : i32
    return %arg0, %c0_i32 : i32, i32
  }
  func.func @transform_1(%arg0: i32) -> (i32, i32) {
    %c0_i32 = arith.constant 0 : i32
    %c0_i32_0 = arith.constant 0 : i32
    %c0_i32_1 = arith.constant 0 : i32
    return %c0_i32, %c0_i32_0 : i32, i32
  }
  func.func @transform_2(%arg0: i32) -> (i32, i32) {
    %c0_i32 = arith.constant 0 : i32
    %c0_i32_0 = arith.constant 0 : i32
    %c0_i32_1 = arith.constant 0 : i32
    return %c0_i32, %c0_i32_0 : i32, i32
  }
  func.func @transform_3(%arg0: i32) -> (i32, i32) {
    %c0_i32 = arith.constant 0 : i32
    %c0_i32_0 = arith.constant 0 : i32
    return %arg0, %c0_i32 : i32, i32
  }
}

</mosaic_0001>

<bundles_post_ra>
// kernel: depthwise_conv1d.1
= control target key start
LH: loop header
LB: loop body
LE: loop exit
PB: predicated region body
PF: predicated region fallthrough
CT: control target
= control target key end

     0   :  { %v122_v0 = vmov 5   ;;  %v123_v3 = vmov 4   ;;  %vm14_vm0 = vcmask 15360   ;;  %s124_s16 = smov 2   ;;  %v125_v4 = vmov 0.0   ;;  %s130_s17 = smov 126   ;;  %s168_s1 = inlined_call_operand.vmem [shape: f32[8,6], index: 1, kind: input, shape index: {}]   ;;  %s169_s0 = inlined_call_operand.vmem [shape: f32[8,16], index: 0, kind: input, shape index: {}]   ;;  %s170_s2 = inlined_call_operand.vmem [shape: f32[8,2], index: 2, kind: input, shape index: {}]   ;;  %s171_s3 = inlined_call_operand.vmem [shape: f32[8,32], index: 3, kind: output, shape index: {}]  }
   0x1   :  { %114 = vset.pattern.permute.xlu1 %v122_v0  ;;  %v23_v1 = vld [vmem:[%s168_s1] sm:$0xff]  ;;  %113 = vset.pattern.permute.xlu0 %v123_v3  ;;  %15 = vst.msk [vmem:[#allocation2] sm:$0xff] %vm14_vm0, %v125_v4  ;;  %v126_v5 = vmov 1   ;;  %v127_v6 = vmov 2   ;;  %v128_v7 = vmov 3   ;;  %v129_v9 = vmov 0  }
   0x2   :  { %v16_v2 = vld [vmem:[%s169_s0] sm:$0xff]  ;;  %70 = vperm.xlu1 %114, %v23_v1   ;;  %vm21_vm1 = vcmask 146448   ;;  %s131_s18 = smov 127   ;;  %vm85_vm2 = vcmask 130048   ;;  %vm96_vm3 = vcmask 261248  }
   0x3   :  { %18 = vrot.lane.b32.xlu0 %v16_v2, %s124_s16  ;;  %v24_v8 = vld [vmem:[%s170_s2] sm:$0xff]  ;;  %s132_s2 = smov 16  }
   0x6   :  { %115 = vset.pattern.permute.xlu1 %v126_v5 }
   0x7   :  { %50 = vperm.xlu0 %113, %v23_v1   ;;  %40 = vperm.xlu1 %115, %v23_v1  }
   0xb   :  { %117 = vset.pattern.permute.xlu0 %v127_v6  ;;  %116 = vset.pattern.permute.xlu1 %v128_v7 }
   0xc   :  { %60 = vperm.xlu0 %117, %v23_v1   ;;  %34 = vperm.xlu1 %116, %v23_v1  }
  0x10   :  { %120 = vset.pattern.permute.xlu0 %v129_v9  ;;  %118 = vset.pattern.permute.xlu1 %v126_v5 }
  0x11   :  { %88 = vperm.xlu1 %118, %v24_v8  }
  0x15   :  { %119 = vset.pattern.permute.xlu1 %v129_v9 }
  0x75   :  { %v19_v10 = vpop.permute.xlu0 %18 }
  0x76   :  { %22 = vst.msk [vmem:[#allocation2] sm:$0xff] %vm21_vm1, %v19_v10 }
  0x7d   :  { %v25_v12 = vld [vmem:[#allocation2] sm:$0xff] }
  0x81   :  { %v71_v11 = vpop.permute.xlu1 %70 }
  0x82   :  { %v73_v13 = vmul.f32 %v71_v11, %v25_v12 }
  0x84   :  { %75 = vrot.lane.b32.xlu0 %v73_v13, %s130_s17 }
  0x86   :  { %v51_v14 = vpop.permute.xlu0 %50  ;;  %v41_v16 = vpop.permute.xlu1 %40 }
  0x87   :  { %v53_v15 = vmul.f32 %v51_v14, %v25_v12  ;;  %v43_v17 = vmul.f32 %v41_v16, %v25_v12 }
  0x88   :  { %81 = vperm.xlu0 %120, %v24_v8  }
  0x89   :  { %55 = vrot.lane.b32.xlu1 %v53_v15, %s131_s18 }
  0x8b   :  { %v61_v18 = vpop.permute.xlu0 %60  ;;  %v35_v20 = vpop.permute.xlu1 %34 }
  0x8c   :  { %121 = vset.pattern.permute.xlu0 %v126_v5  ;;  %v63_v19 = vmul.f32 %v61_v18, %v25_v12  ;;  %v37_v22 = vmul.f32 %v35_v20, %v25_v12 }
  0x8d   :  { %28 = vperm.xlu1 %119, %v23_v1  }
  0x90   :  { %v89_v21 = vpop.permute.xlu1 %88 }
  0x91   :  { %45 = vrot.lane.b32.xlu1 %v43_v17, %s131_s18 }
  0x95   :  { %65 = vrot.lane.b32.xlu1 %v63_v19, %s130_s17 }
  0xf6   :  { %v76_v25 = vpop.permute.xlu0 %75 }
  0xfb   :  { %v56_v23 = vpop.permute.xlu1 %55 }
  0xfc   :  { %v58_v24 = vadd.f32 %v56_v23, %v37_v22 }
  0xfe   :  { %v78_v26 = vadd.f32 %v76_v25, %v58_v24 }
 0x100   :  { %v91_v27 = vadd.f32 %v89_v21, %v78_v26 }
 0x102   :  { %93 = vrot.lane.b32.xlu0 %v91_v27, %s132_s2 }
 0x107   :  { %v82_v33 = vpop.permute.xlu0 %81 }
 0x10c   :  { %v29_v28 = vpop.permute.xlu1 %28 }
 0x10d   :  { %v31_v30 = vmul.f32 %v29_v28, %v25_v12 }
 0x110   :  { %v46_v29 = vpop.permute.xlu1 %45 }
 0x111   :  { %v48_v31 = vadd.f32 %v46_v29, %v31_v30 }
 0x114   :  { %v66_v32 = vpop.permute.xlu1 %65 }
 0x115   :  { %v68_v34 = vadd.f32 %v66_v32, %v48_v31 }
 0x117   :  { %v84_v35 = vadd.f32 %v82_v33, %v68_v34 }
 0x119   :  { %86 = vst.msk [vmem:[%s171_s3] sm:$0xff] %vm85_vm2, %v84_v35 }
 0x174   :  { %v94_v36 = vpop.permute.xlu0 %93 }
 0x175   :  { %97 = vst.msk [vmem:[%s171_s3] sm:$0xff] %vm96_vm3, %v94_v36 }

</bundles_post_ra>
